<compile_context>
chip_gen: v7x
topology: tpu7x:2x2x1
jax: 0.10.0
libtpu: 0.0.40
codegen_flags: <defaults>
</compile_context>

<pallas_src>
import math
import functools

import jax
import jax.numpy as jnp
from jax.experimental import pallas as pl
from jax.experimental.pallas import tpu as pltpu


# ----------------------------------------------------------------------------
# In-kernel helpers
# ----------------------------------------------------------------------------
def _layernorm(x, gamma, beta, eps=1e-5):
    # f32 LayerNorm (unbiased=False); rsqrt goes to the EUP slot.
    mean = jnp.mean(x, axis=-1, keepdims=True)
    xc = x - mean
    var = jnp.mean(xc * xc, axis=-1, keepdims=True)
    return (xc * jax.lax.rsqrt(var + eps)) * gamma + beta


def _gelu_exact(x):
    # torch.nn.GELU default (erf-based, exact)
    return 0.5 * x * (1.0 + jax.lax.erf(x * (1.0 / math.sqrt(2.0))))


def _pick_tile(n, cap, align):
    """Largest divisor of n that is <= cap, preferring multiples of `align`."""
    cap = min(n, cap)
    divisors = [t for t in range(1, cap + 1) if n % t == 0]
    aligned = [t for t in divisors if t % align == 0]
    return (aligned or divisors)[-1]


# ----------------------------------------------------------------------------
# Kernels
# ----------------------------------------------------------------------------
def block_kernel(x_ref,
                 wq_ref, wk_ref, wv_ref, wo_ref,
                 g1_ref, be1_ref,
                 w1_ref, b1_ref, w2_ref, b2_ref,
                 g2_ref, be2_ref,
                 out_ref,
                 *, num_heads, tile_q, eps=1e-5):
    """One transformer Block for a (batch, query-tile) grid cell."""
    qi = pl.program_id(1)

    x_kv = x_ref[0]                          # (S, D) f32 — full sequence (K/V)
    S, D = x_kv.shape
    TQ = tile_q
    H = num_heads

    q_start = pl.multiple_of(qi * TQ, TQ)
    x_q = x_ref[0, pl.ds(q_start, TQ), :]    # (TQ, D) f32 — residual / query tile

    xq_b = x_q.astype(jnp.bfloat16)
    xkv_b = x_kv.astype(jnp.bfloat16)

    # Causal mask for this query tile (shared across heads).
    q_pos = qi * TQ + jax.lax.broadcasted_iota(jnp.int32, (TQ, S), 0)
    k_pos = jax.lax.broadcasted_iota(jnp.int32, (TQ, S), 1)
    causal = k_pos <= q_pos
    neg_big = jnp.float32(-1e30)             # finite masked value (robust vs -inf)

    # ---- causal multi-head self-attention (heads statically unrolled) ------
    # Per-head weight slices come from the wrapper (no lane-axis activation
    # slicing / concat in-kernel); Wq already carries the 1/sqrt(head_dim)
    # scale; all matmuls are bf16-in / f32-acc.
    attn = jnp.zeros((TQ, D), jnp.float32)
    for h in range(H):
        q_h = jnp.dot(xq_b, wq_ref[h], preferred_element_type=jnp.float32)    # (TQ, hd)
        k_h = jnp.dot(xkv_b, wk_ref[h], preferred_element_type=jnp.float32)   # (S, hd)
        v_h = jnp.dot(xkv_b, wv_ref[h], preferred_element_type=jnp.float32)   # (S, hd)

        s = jnp.einsum('qd,kd->qk',
                       q_h.astype(jnp.bfloat16), k_h.astype(jnp.bfloat16),
                       preferred_element_type=jnp.float32)                    # (TQ, S)
        s = jnp.where(causal, s, neg_big)
        m = jnp.max(s, axis=-1, keepdims=True)
        e = jnp.exp(s - m)
        p = e * pl.reciprocal(jnp.sum(e, axis=-1, keepdims=True), approx=True)

        ctx = jnp.dot(p.astype(jnp.bfloat16), v_h.astype(jnp.bfloat16),
                      preferred_element_type=jnp.float32)                     # (TQ, hd)
        # Fold the head-concat into the output projection: sum_h ctx_h @ Wo_h.
        attn = attn + jnp.dot(ctx.astype(jnp.bfloat16), wo_ref[h],
                              preferred_element_type=jnp.float32)             # (TQ, D)

    # residual + LayerNorm1 (f32)
    x = _layernorm(x_q + attn, g1_ref[0], be1_ref[0], eps)

    # ---- MLP: Linear -> Dropout(p=0) -> GELU(exact) -> Linear ---------------
    h1 = jnp.dot(x.astype(jnp.bfloat16), w1_ref[...],
                 preferred_element_type=jnp.float32) + b1_ref[0]
    h1 = _gelu_exact(h1)
    h2 = jnp.dot(h1.astype(jnp.bfloat16), w2_ref[...],
                 preferred_element_type=jnp.float32) + b2_ref[0]

    # residual + LayerNorm2
    out_ref[0] = _layernorm(x + h2, g2_ref[0], be2_ref[0], eps)


def head_kernel(x_ref, g_ref, be_ref, w_ref, b_ref, out_ref, *, eps=1e-5):
    """Final LayerNorm + decode_to_vocab, one (batch, vocab-tile) per step."""
    x = _layernorm(x_ref[0], g_ref[0], be_ref[0], eps)            # (S, D) f32
    out_ref[0] = jnp.dot(x.astype(jnp.bfloat16), w_ref[...],
                         preferred_element_type=jnp.float32) + b_ref[0]


# ----------------------------------------------------------------------------
# Wrappers (pallas_call plumbing)
# ----------------------------------------------------------------------------
def _split_heads_in(w_t, num_heads):
    """(D_in, D_out) -> (H, D_in, hd); output features are head-major."""
    din, dout = w_t.shape
    hd = dout // num_heads
    return jnp.transpose(w_t.reshape(din, num_heads, hd), (1, 0, 2))


def block_forward(x, p, num_heads):
    B, S, D = x.shape
    Fd = p["w1"].shape[0]
    H = num_heads
    assert D % H == 0
    hd = D // H

    TQ = _pick_tile(S, 256, 8)
    NQ = S // TQ

    bf16 = jnp.bfloat16
    scale = 1.0 / math.sqrt(hd)                                    # temp / sqrt(D // H), temp=1
    qkv_t = p["qkv_w"].T                                           # (D, 3D)
    # Fold the attention scale into Wq (zero in-kernel cost).
    wq = (_split_heads_in(qkv_t[:, 0:D], H) * scale).astype(bf16)  # (H, D, hd)
    wk = _split_heads_in(qkv_t[:, D:2 * D], H).astype(bf16)        # (H, D, hd)
    wv = _split_heads_in(qkv_t[:, 2 * D:3 * D], H).astype(bf16)    # (H, D, hd)
    wo = p["o_w"].T.reshape(H, hd, D).astype(bf16)                 # (H, hd, D)
    w1 = p["w1"].T.astype(bf16)                                    # (D, F)
    w2 = p["w2"].T.astype(bf16)                                    # (F, D)
    b1 = p["b1"].reshape(1, Fd)
    b2 = p["b2"].reshape(1, D)
    g1 = p["g1"].reshape(1, D)
    be1 = p["be1"].reshape(1, D)
    g2 = p["g2"].reshape(1, D)
    be2 = p["be2"].reshape(1, D)

    def const_spec(shape):
        nd = len(shape)
        return pl.BlockSpec(shape, lambda b, q, _nd=nd: (0,) * _nd)

    flops = int(2 * B * S * D * 3 * D          # qkv projections
                + 4 * B * S * S * D            # scores + context (all heads)
                + 2 * B * S * D * D            # output projection
                + 4 * B * S * D * Fd)          # MLP
    cost = pl.CostEstimate(
        flops=flops,
        transcendentals=int(B * H * S * S + B * S * Fd),
        bytes_accessed=int(4 * 2 * B * S * D            # x in (once/batch) + out
                           + 2 * (4 * D * D + 2 * D * Fd)   # bf16 weights
                           + 4 * (5 * D + Fd)),              # LN params + biases
    )

    kernel = functools.partial(block_kernel, num_heads=H, tile_q=TQ)
    return pl.pallas_call(
        kernel,
        out_shape=jax.ShapeDtypeStruct((B, S, D), jnp.float32),
        grid=(B, NQ),
        in_specs=[
            pl.BlockSpec((1, S, D), lambda b, q: (b, 0, 0)),    # full seq (K/V + residual slice)
            const_spec(wq.shape), const_spec(wk.shape),
            const_spec(wv.shape), const_spec(wo.shape),
            const_spec(g1.shape), const_spec(be1.shape),
            const_spec(w1.shape), const_spec(b1.shape),
            const_spec(w2.shape), const_spec(b2.shape),
            const_spec(g2.shape), const_spec(be2.shape),
        ],
        out_specs=pl.BlockSpec((1, TQ, D), lambda b, q: (b, q, 0)),
        compiler_params=pltpu.CompilerParams(
            dimension_semantics=("parallel", "parallel"),
            vmem_limit_bytes=48 * 1024 * 1024,
        ),
        cost_estimate=cost,
    )(x, wq, wk, wv, wo, g1, be1, w1, b1, w2, b2, g2, be2)


def head_forward(x, params):
    B, S, D = x.shape
    V = params["decode_w"].shape[0]
    TV = _pick_tile(V, 2048, 128)
    NV = V // TV

    w = params["decode_w"].T.astype(jnp.bfloat16)                  # (D, V)
    b = params["decode_b"].reshape(1, V)
    g = params["final_gamma"].reshape(1, D)
    be = params["final_beta"].reshape(1, D)

    cost = pl.CostEstimate(
        flops=int(2 * B * S * D * V),
        transcendentals=0,
        bytes_accessed=int(4 * B * S * D + 2 * D * V + 4 * B * S * V
                           + 4 * (2 * D + V)),
    )

    return pl.pallas_call(
        head_kernel,
        out_shape=jax.ShapeDtypeStruct((B, S, V), jnp.float32),
        grid=(B, NV),
        in_specs=[
            pl.BlockSpec((1, S, D), lambda b_, v_: (b_, 0, 0)),
            pl.BlockSpec((1, D), lambda b_, v_: (0, 0)),
            pl.BlockSpec((1, D), lambda b_, v_: (0, 0)),
            pl.BlockSpec((D, TV), lambda b_, v_: (0, v_)),
            pl.BlockSpec((1, TV), lambda b_, v_: (0, v_)),
        ],
        out_specs=pl.BlockSpec((1, S, TV), lambda b_, v_: (b_, 0, v_)),
        compiler_params=pltpu.CompilerParams(
            dimension_semantics=("parallel", "parallel"),
            vmem_limit_bytes=48 * 1024 * 1024,
        ),
        cost_estimate=cost,
    )(x, g, be, w, b)


# ----------------------------------------------------------------------------
# Parameter init (deterministic, mirrors the PyTorch __init__ shapes)
# ----------------------------------------------------------------------------
def init_params(key, *, num_layers, num_heads, embed_dim, vocab_size,
                ff_dim, output_vocab_size, seq_len):
    std = 0.02
    keys = jax.random.split(key, 3 + num_layers)
    params = {
        "token_embed": std * jax.random.normal(keys[0], (vocab_size, embed_dim), jnp.float32),
        "position_embed": std * jax.random.normal(keys[1], (seq_len, embed_dim), jnp.float32),
        "decode_w": std * jax.random.normal(keys[2], (output_vocab_size, embed_dim), jnp.float32),
        "decode_b": jnp.zeros((output_vocab_size,), jnp.float32),
        "final_gamma": jnp.ones((embed_dim,), jnp.float32),
        "final_beta": jnp.zeros((embed_dim,), jnp.float32),
        "layers": [],
    }
    for l in range(num_layers):
        lk = jax.random.split(keys[3 + l], 4)
        params["layers"].append(dict(
            qkv_w=std * jax.random.normal(lk[0], (3 * embed_dim, embed_dim), jnp.float32),
            o_w=std * jax.random.normal(lk[1], (embed_dim, embed_dim), jnp.float32),
            w1=std * jax.random.normal(lk[2], (ff_dim, embed_dim), jnp.float32),
            b1=jnp.zeros((ff_dim,), jnp.float32),
            w2=std * jax.random.normal(lk[3], (embed_dim, ff_dim), jnp.float32),
            b2=jnp.zeros((embed_dim,), jnp.float32),
            g1=jnp.ones((embed_dim,), jnp.float32),
            be1=jnp.zeros((embed_dim,), jnp.float32),
            g2=jnp.ones((embed_dim,), jnp.float32),
            be2=jnp.zeros((embed_dim,), jnp.float32),
        ))
    return params


# ----------------------------------------------------------------------------
# Full forward pass
# ----------------------------------------------------------------------------
def transformer_forward(idx, params, num_heads):
    B, S = idx.shape
    # Embedding lookups are plain-JAX glue (gather); everything else is Pallas.
    tok = jnp.take(params["token_embed"], idx, axis=0)          # (B, S, D)
    pos = params["position_embed"][:S][None, :, :]              # (1, S, D)
    x = tok + pos                                               # dropout p=0
    for layer_params in params["layers"]:
        x = block_forward(x, layer_params, num_heads)
    logits = head_forward(x, params)
    return logits


# ----------------------------------------------------------------------------
if __name__ == "__main__":
    # small, forward-consistent shapes
    num_layers = 2
    num_heads = 2
    embed_dim = 32
    ff_dim = 64
    vocab_size = 16
    output_vocab_size = 16
    seq_len = 8
    batch = 2

    key = jax.random.PRNGKey(0)
    pkey, ikey = jax.random.split(key)
    params = init_params(
        pkey,
        num_layers=num_layers, num_heads=num_heads, embed_dim=embed_dim,
        vocab_size=vocab_size, ff_dim=ff_dim,
        output_vocab_size=output_vocab_size, seq_len=seq_len,
    )
    idx = jax.random.randint(ikey, (batch, seq_len), 0, vocab_size, dtype=jnp.int32)

    logits = transformer_forward(idx, params, num_heads)
    jax.block_until_ready(logits)
    assert logits.shape == (batch, seq_len, output_vocab_size)
    assert bool(jnp.all(jnp.isfinite(logits)))
    print("KERNEL_OK")
</pallas_src>

<mosaic_0001>
module attributes {stable_mosaic.version = 11 : i64} {
  func.func @block_kernel(%arg0: i32, %arg1: i32, %arg2: memref<1x8x32xf32, #tpu.memory_space<vmem>>, %arg3: memref<2x32x16xbf16, #tpu.memory_space<vmem>>, %arg4: memref<2x32x16xbf16, #tpu.memory_space<vmem>>, %arg5: memref<2x32x16xbf16, #tpu.memory_space<vmem>>, %arg6: memref<2x16x32xbf16, #tpu.memory_space<vmem>>, %arg7: memref<1x32xf32, #tpu.memory_space<vmem>>, %arg8: memref<1x32xf32, #tpu.memory_space<vmem>>, %arg9: memref<32x64xbf16, #tpu.memory_space<vmem>>, %arg10: memref<1x64xf32, #tpu.memory_space<vmem>>, %arg11: memref<64x32xbf16, #tpu.memory_space<vmem>>, %arg12: memref<1x32xf32, #tpu.memory_space<vmem>>, %arg13: memref<1x32xf32, #tpu.memory_space<vmem>>, %arg14: memref<1x32xf32, #tpu.memory_space<vmem>>, %arg15: memref<1x8x32xf32, #tpu.memory_space<vmem>>) attributes {dimension_semantics = [#tpu.dimension_semantics<parallel>, #tpu.dimension_semantics<parallel>], iteration_bounds = array<i64: 2, 1>, scalar_prefetch = 0 : i64, scratch_operands = 0 : i64, tpu.core_type = #tpu.core_type<tc>, window_params = [{transform_indices = @transform_0, window_bounds = array<i64: 1, 8, 32>}, {pipeline_mode = #tpu.pipeline_mode<synchronous>, transform_indices = @transform_1, window_bounds = array<i64: 2, 32, 16>}, {pipeline_mode = #tpu.pipeline_mode<synchronous>, transform_indices = @transform_2, window_bounds = array<i64: 2, 32, 16>}, {pipeline_mode = #tpu.pipeline_mode<synchronous>, transform_indices = @transform_3, window_bounds = array<i64: 2, 32, 16>}, {pipeline_mode = #tpu.pipeline_mode<synchronous>, transform_indices = @transform_4, window_bounds = array<i64: 2, 16, 32>}, {pipeline_mode = #tpu.pipeline_mode<synchronous>, transform_indices = @transform_5, window_bounds = array<i64: 1, 32>}, {pipeline_mode = #tpu.pipeline_mode<synchronous>, transform_indices = @transform_6, window_bounds = array<i64: 1, 32>}, {pipeline_mode = #tpu.pipeline_mode<synchronous>, transform_indices = @transform_7, window_bounds = array<i64: 32, 64>}, {pipeline_mode = #tpu.pipeline_mode<synchronous>, transform_indices = @transform_8, window_bounds = array<i64: 1, 64>}, {pipeline_mode = #tpu.pipeline_mode<synchronous>, transform_indices = @transform_9, window_bounds = array<i64: 64, 32>}, {pipeline_mode = #tpu.pipeline_mode<synchronous>, transform_indices = @transform_10, window_bounds = array<i64: 1, 32>}, {pipeline_mode = #tpu.pipeline_mode<synchronous>, transform_indices = @transform_11, window_bounds = array<i64: 1, 32>}, {pipeline_mode = #tpu.pipeline_mode<synchronous>, transform_indices = @transform_12, window_bounds = array<i64: 1, 32>}, {transform_indices = @transform_13, window_bounds = array<i64: 1, 8, 32>}]} {
    %c0 = arith.constant 0 : index
    %c0_0 = arith.constant 0 : index
    %c0_1 = arith.constant 0 : index
    %0 = vector.load %arg2[%c0, %c0_0, %c0_1] : memref<1x8x32xf32, #tpu.memory_space<vmem>>, vector<1x8x32xf32>
    %1 = vector.shape_cast %0 : vector<1x8x32xf32> to vector<8x32xf32>
    %c8_i32 = arith.constant 8 : i32
    %2 = arith.muli %arg1, %c8_i32 : i32
    %3 = tpu.assume_multiple %2, 8 : i32
    %c0_2 = arith.constant 0 : index
    %4 = arith.index_cast %3 : i32 to index
    %c0_3 = arith.constant 0 : index
    %5 = vector.load %arg2[%c0_2, %4, %c0_3] : memref<1x8x32xf32, #tpu.memory_space<vmem>>, vector<1x8x32xf32>
    %6 = vector.shape_cast %5 : vector<1x8x32xf32> to vector<8x32xf32>
    %7 = arith.truncf %6 : vector<8x32xf32> to vector<8x32xbf16>
    %8 = arith.truncf %1 : vector<8x32xf32> to vector<8x32xbf16>
    %c8_i32_4 = arith.constant 8 : i32
    %9 = arith.muli %arg1, %c8_i32_4 : i32
    %10 = tpu.iota {dimensions = array<i32: 0>} : vector<8x8xi32>
    %11 = vector.broadcast %9 : i32 to vector<8x8xi32>
    %12 = arith.addi %11, %10 : vector<8x8xi32>
    %13 = tpu.iota {dimensions = array<i32: 1>} : vector<8x8xi32>
    %14 = arith.cmpi sle, %13, %12 : vector<8x8xi32>
    %cst = arith.constant 0.000000e+00 : f32
    %15 = vector.broadcast %cst : f32 to vector<8x32xf32>
    %c0_5 = arith.constant 0 : index
    %c0_6 = arith.constant 0 : index
    %c0_7 = arith.constant 0 : index
    %16 = vector.load %arg3[%c0_5, %c0_6, %c0_7] : memref<2x32x16xbf16, #tpu.memory_space<vmem>>, vector<1x32x16xbf16>
    %17 = vector.shape_cast %16 : vector<1x32x16xbf16> to vector<32x16xbf16>
    %cst_8 = arith.constant dense<0.000000e+00> : vector<8x16xf32>
    %18 = tpu.matmul %7, %17, %cst_8 {dimension_numbers = #tpu.dot_dimension_numbers<[1], [0], [0], [1], [0, 0, 1, 1], [], []>} : vector<8x32xbf16>, vector<32x16xbf16>, vector<8x16xf32> -> vector<8x16xf32>
    %c0_9 = arith.constant 0 : index
    %c0_10 = arith.constant 0 : index
    %c0_11 = arith.constant 0 : index
    %19 = vector.load %arg4[%c0_9, %c0_10, %c0_11] : memref<2x32x16xbf16, #tpu.memory_space<vmem>>, vector<1x32x16xbf16>
    %20 = vector.shape_cast %19 : vector<1x32x16xbf16> to vector<32x16xbf16>
    %cst_12 = arith.constant dense<0.000000e+00> : vector<8x16xf32>
    %21 = tpu.matmul %8, %20, %cst_12 {dimension_numbers = #tpu.dot_dimension_numbers<[1], [0], [0], [1], [0, 0, 1, 1], [], []>} : vector<8x32xbf16>, vector<32x16xbf16>, vector<8x16xf32> -> vector<8x16xf32>
    %c0_13 = arith.constant 0 : index
    %c0_14 = arith.constant 0 : index
    %c0_15 = arith.constant 0 : index
    %22 = vector.load %arg5[%c0_13, %c0_14, %c0_15] : memref<2x32x16xbf16, #tpu.memory_space<vmem>>, vector<1x32x16xbf16>
    %23 = vector.shape_cast %22 : vector<1x32x16xbf16> to vector<32x16xbf16>
    %cst_16 = arith.constant dense<0.000000e+00> : vector<8x16xf32>
    %24 = tpu.matmul %8, %23, %cst_16 {dimension_numbers = #tpu.dot_dimension_numbers<[1], [0], [0], [1], [0, 0, 1, 1], [], []>} : vector<8x32xbf16>, vector<32x16xbf16>, vector<8x16xf32> -> vector<8x16xf32>
    %25 = arith.truncf %18 : vector<8x16xf32> to vector<8x16xbf16>
    %26 = arith.truncf %21 : vector<8x16xf32> to vector<8x16xbf16>
    "tpu.trace_start"() <{level = 10 : i32, message = "qd,kd->qk"}> : () -> ()
    %cst_17 = arith.constant dense<0.000000e+00> : vector<8x8xf32>
    %27 = tpu.matmul %25, %26, %cst_17 {dimension_numbers = #tpu.dot_dimension_numbers<[1], [1], [0], [0], [0, 0, 1, 0], [], []>} : vector<8x16xbf16>, vector<8x16xbf16>, vector<8x8xf32> -> vector<8x8xf32>
    %cst_18 = arith.constant -1.000000e+30 : f32
    "tpu.trace_stop"() : () -> ()
    %28 = vector.broadcast %cst_18 : f32 to vector<8x8xf32>
    %29 = arith.select %14, %27, %28 : vector<8x8xi1>, vector<8x8xf32>
    %cst_19 = arith.constant dense<0xFF800000> : vector<8xf32>
    %30 = vector.multi_reduction <maximumf>, %29, %cst_19 [1] : vector<8x8xf32> to vector<8xf32>
    %31 = vector.shape_cast %30 : vector<8xf32> to vector<8x1xf32>
    %32 = vector.broadcast %31 : vector<8x1xf32> to vector<8x8xf32>
    %33 = arith.subf %29, %32 : vector<8x8xf32>
    %34 = math.exp %33 : vector<8x8xf32>
    %cst_20 = arith.constant dense<0.000000e+00> : vector<8xf32>
    %35 = vector.multi_reduction <add>, %34, %cst_20 [1] : vector<8x8xf32> to vector<8xf32>
    %36 = vector.shape_cast %35 : vector<8xf32> to vector<8x1xf32>
    %37 = tpu.reciprocal %36 {approx = true} : vector<8x1xf32> -> vector<8x1xf32>
    %38 = vector.broadcast %37 : vector<8x1xf32> to vector<8x8xf32>
    %39 = arith.mulf %34, %38 : vector<8x8xf32>
    %40 = arith.truncf %39 : vector<8x8xf32> to vector<8x8xbf16>
    %41 = arith.truncf %24 : vector<8x16xf32> to vector<8x16xbf16>
    %cst_21 = arith.constant dense<0.000000e+00> : vector<8x16xf32>
    %42 = tpu.matmul %40, %41, %cst_21 {dimension_numbers = #tpu.dot_dimension_numbers<[1], [0], [0], [1], [0, 0, 1, 1], [], []>} : vector<8x8xbf16>, vector<8x16xbf16>, vector<8x16xf32> -> vector<8x16xf32>
    %43 = arith.truncf %42 : vector<8x16xf32> to vector<8x16xbf16>
    %c0_22 = arith.constant 0 : index
    %c0_23 = arith.constant 0 : index
    %c0_24 = arith.constant 0 : index
    %44 = vector.load %arg6[%c0_22, %c0_23, %c0_24] : memref<2x16x32xbf16, #tpu.memory_space<vmem>>, vector<1x16x32xbf16>
    %45 = vector.shape_cast %44 : vector<1x16x32xbf16> to vector<16x32xbf16>
    %cst_25 = arith.constant dense<0.000000e+00> : vector<8x32xf32>
    %46 = tpu.matmul %43, %45, %cst_25 {dimension_numbers = #tpu.dot_dimension_numbers<[1], [0], [0], [1], [0, 0, 1, 1], [], []>} : vector<8x16xbf16>, vector<16x32xbf16>, vector<8x32xf32> -> vector<8x32xf32>
    %47 = arith.addf %15, %46 : vector<8x32xf32>
    %c1 = arith.constant 1 : index
    %c0_26 = arith.constant 0 : index
    %c0_27 = arith.constant 0 : index
    %48 = vector.load %arg3[%c1, %c0_26, %c0_27] : memref<2x32x16xbf16, #tpu.memory_space<vmem>>, vector<1x32x16xbf16>
    %49 = vector.shape_cast %48 : vector<1x32x16xbf16> to vector<32x16xbf16>
    %cst_28 = arith.constant dense<0.000000e+00> : vector<8x16xf32>
    %50 = tpu.matmul %7, %49, %cst_28 {dimension_numbers = #tpu.dot_dimension_numbers<[1], [0], [0], [1], [0, 0, 1, 1], [], []>} : vector<8x32xbf16>, vector<32x16xbf16>, vector<8x16xf32> -> vector<8x16xf32>
    %c1_29 = arith.constant 1 : index
    %c0_30 = arith.constant 0 : index
    %c0_31 = arith.constant 0 : index
    %51 = vector.load %arg4[%c1_29, %c0_30, %c0_31] : memref<2x32x16xbf16, #tpu.memory_space<vmem>>, vector<1x32x16xbf16>
    %52 = vector.shape_cast %51 : vector<1x32x16xbf16> to vector<32x16xbf16>
    %cst_32 = arith.constant dense<0.000000e+00> : vector<8x16xf32>
    %53 = tpu.matmul %8, %52, %cst_32 {dimension_numbers = #tpu.dot_dimension_numbers<[1], [0], [0], [1], [0, 0, 1, 1], [], []>} : vector<8x32xbf16>, vector<32x16xbf16>, vector<8x16xf32> -> vector<8x16xf32>
    %c1_33 = arith.constant 1 : index
    %c0_34 = arith.constant 0 : index
    %c0_35 = arith.constant 0 : index
    %54 = vector.load %arg5[%c1_33, %c0_34, %c0_35] : memref<2x32x16xbf16, #tpu.memory_space<vmem>>, vector<1x32x16xbf16>
    %55 = vector.shape_cast %54 : vector<1x32x16xbf16> to vector<32x16xbf16>
    %cst_36 = arith.constant dense<0.000000e+00> : vector<8x16xf32>
    %56 = tpu.matmul %8, %55, %cst_36 {dimension_numbers = #tpu.dot_dimension_numbers<[1], [0], [0], [1], [0, 0, 1, 1], [], []>} : vector<8x32xbf16>, vector<32x16xbf16>, vector<8x16xf32> -> vector<8x16xf32>
    %57 = arith.truncf %50 : vector<8x16xf32> to vector<8x16xbf16>
    %58 = arith.truncf %53 : vector<8x16xf32> to vector<8x16xbf16>
    "tpu.trace_start"() <{level = 10 : i32, message = "qd,kd->qk"}> : () -> ()
    %cst_37 = arith.constant dense<0.000000e+00> : vector<8x8xf32>
    %59 = tpu.matmul %57, %58, %cst_37 {dimension_numbers = #tpu.dot_dimension_numbers<[1], [1], [0], [0], [0, 0, 1, 0], [], []>} : vector<8x16xbf16>, vector<8x16xbf16>, vector<8x8xf32> -> vector<8x8xf32>
    %cst_38 = arith.constant -1.000000e+30 : f32
    "tpu.trace_stop"() : () -> ()
    %60 = vector.broadcast %cst_38 : f32 to vector<8x8xf32>
    %61 = arith.select %14, %59, %60 : vector<8x8xi1>, vector<8x8xf32>
    %cst_39 = arith.constant dense<0xFF800000> : vector<8xf32>
    %62 = vector.multi_reduction <maximumf>, %61, %cst_39 [1] : vector<8x8xf32> to vector<8xf32>
    %63 = vector.shape_cast %62 : vector<8xf32> to vector<8x1xf32>
    %64 = vector.broadcast %63 : vector<8x1xf32> to vector<8x8xf32>
    %65 = arith.subf %61, %64 : vector<8x8xf32>
    %66 = math.exp %65 : vector<8x8xf32>
    %cst_40 = arith.constant dense<0.000000e+00> : vector<8xf32>
    %67 = vector.multi_reduction <add>, %66, %cst_40 [1] : vector<8x8xf32> to vector<8xf32>
    %68 = vector.shape_cast %67 : vector<8xf32> to vector<8x1xf32>
    %69 = tpu.reciprocal %68 {approx = true} : vector<8x1xf32> -> vector<8x1xf32>
    %70 = vector.broadcast %69 : vector<8x1xf32> to vector<8x8xf32>
    %71 = arith.mulf %66, %70 : vector<8x8xf32>
    %72 = arith.truncf %71 : vector<8x8xf32> to vector<8x8xbf16>
    %73 = arith.truncf %56 : vector<8x16xf32> to vector<8x16xbf16>
    %cst_41 = arith.constant dense<0.000000e+00> : vector<8x16xf32>
    %74 = tpu.matmul %72, %73, %cst_41 {dimension_numbers = #tpu.dot_dimension_numbers<[1], [0], [0], [1], [0, 0, 1, 1], [], []>} : vector<8x8xbf16>, vector<8x16xbf16>, vector<8x16xf32> -> vector<8x16xf32>
    %75 = arith.truncf %74 : vector<8x16xf32> to vector<8x16xbf16>
    %c1_42 = arith.constant 1 : index
    %c0_43 = arith.constant 0 : index
    %c0_44 = arith.constant 0 : index
    %76 = vector.load %arg6[%c1_42, %c0_43, %c0_44] : memref<2x16x32xbf16, #tpu.memory_space<vmem>>, vector<1x16x32xbf16>
    %77 = vector.shape_cast %76 : vector<1x16x32xbf16> to vector<16x32xbf16>
    %cst_45 = arith.constant dense<0.000000e+00> : vector<8x32xf32>
    %78 = tpu.matmul %75, %77, %cst_45 {dimension_numbers = #tpu.dot_dimension_numbers<[1], [0], [0], [1], [0, 0, 1, 1], [], []>} : vector<8x16xbf16>, vector<16x32xbf16>, vector<8x32xf32> -> vector<8x32xf32>
    %79 = arith.addf %47, %78 : vector<8x32xf32>
    %80 = arith.addf %6, %79 : vector<8x32xf32>
    %c0_46 = arith.constant 0 : index
    %c0_47 = arith.constant 0 : index
    %81 = vector.load %arg7[%c0_46, %c0_47] : memref<1x32xf32, #tpu.memory_space<vmem>>, vector<1x32xf32>
    %82 = vector.shape_cast %81 : vector<1x32xf32> to vector<32xf32>
    %c0_48 = arith.constant 0 : index
    %c0_49 = arith.constant 0 : index
    %83 = vector.load %arg8[%c0_48, %c0_49] : memref<1x32xf32, #tpu.memory_space<vmem>>, vector<1x32xf32>
    %84 = vector.shape_cast %83 : vector<1x32xf32> to vector<32xf32>
    %cst_50 = arith.constant dense<0.000000e+00> : vector<8xf32>
    %85 = vector.multi_reduction <add>, %80, %cst_50 [1] : vector<8x32xf32> to vector<8xf32>
    %86 = vector.shape_cast %85 : vector<8xf32> to vector<8x1xf32>
    %cst_51 = arith.constant 3.200000e+01 : f32
    %87 = vector.broadcast %cst_51 : f32 to vector<8x1xf32>
    %88 = arith.divf %86, %87 : vector<8x1xf32>
    %89 = vector.broadcast %88 : vector<8x1xf32> to vector<8x32xf32>
    %90 = arith.subf %80, %89 : vector<8x32xf32>
    %91 = arith.mulf %90, %90 : vector<8x32xf32>
    %cst_52 = arith.constant dense<0.000000e+00> : vector<8xf32>
    %92 = vector.multi_reduction <add>, %91, %cst_52 [1] : vector<8x32xf32> to vector<8xf32>
    %93 = vector.shape_cast %92 : vector<8xf32> to vector<8x1xf32>
    %cst_53 = arith.constant 3.200000e+01 : f32
    %94 = vector.broadcast %cst_53 : f32 to vector<8x1xf32>
    %95 = arith.divf %93, %94 : vector<8x1xf32>
    %cst_54 = arith.constant 9.99999974E-6 : f32
    %96 = vector.broadcast %cst_54 : f32 to vector<8x1xf32>
    %97 = arith.addf %95, %96 : vector<8x1xf32>
    %98 = math.rsqrt %97 : vector<8x1xf32>
    %99 = vector.broadcast %98 : vector<8x1xf32> to vector<8x32xf32>
    %100 = arith.mulf %90, %99 : vector<8x32xf32>
    %101 = vector.shape_cast %82 : vector<32xf32> to vector<1x32xf32>
    %102 = vector.broadcast %101 : vector<1x32xf32> to vector<8x32xf32>
    %103 = arith.mulf %100, %102 : vector<8x32xf32>
    %104 = vector.shape_cast %84 : vector<32xf32> to vector<1x32xf32>
    %105 = vector.broadcast %104 : vector<1x32xf32> to vector<8x32xf32>
    %106 = arith.addf %103, %105 : vector<8x32xf32>
    %107 = arith.truncf %106 : vector<8x32xf32> to vector<8x32xbf16>
    %c0_55 = arith.constant 0 : index
    %c0_56 = arith.constant 0 : index
    %108 = vector.load %arg9[%c0_55, %c0_56] : memref<32x64xbf16, #tpu.memory_space<vmem>>, vector<32x64xbf16>
    %cst_57 = arith.constant dense<0.000000e+00> : vector<8x64xf32>
    %109 = tpu.matmul %107, %108, %cst_57 {dimension_numbers = #tpu.dot_dimension_numbers<[1], [0], [0], [1], [0, 0, 1, 1], [], []>} : vector<8x32xbf16>, vector<32x64xbf16>, vector<8x64xf32> -> vector<8x64xf32>
    %c0_58 = arith.constant 0 : index
    %c0_59 = arith.constant 0 : index
    %110 = vector.load %arg10[%c0_58, %c0_59] : memref<1x64xf32, #tpu.memory_space<vmem>>, vector<1x64xf32>
    %111 = vector.shape_cast %110 : vector<1x64xf32> to vector<64xf32>
    %112 = vector.shape_cast %111 : vector<64xf32> to vector<1x64xf32>
    %113 = vector.broadcast %112 : vector<1x64xf32> to vector<8x64xf32>
    %114 = arith.addf %109, %113 : vector<8x64xf32>
    %cst_60 = arith.constant 5.000000e-01 : f32
    %115 = vector.broadcast %cst_60 : f32 to vector<8x64xf32>
    %116 = arith.mulf %115, %114 : vector<8x64xf32>
    %cst_61 = arith.constant 0.707106769 : f32
    %117 = vector.broadcast %cst_61 : f32 to vector<8x64xf32>
    %118 = arith.mulf %114, %117 : vector<8x64xf32>
    %119 = math.erf %118 : vector<8x64xf32>
    %cst_62 = arith.constant 1.000000e+00 : f32
    %120 = vector.broadcast %cst_62 : f32 to vector<8x64xf32>
    %121 = arith.addf %120, %119 : vector<8x64xf32>
    %122 = arith.mulf %116, %121 : vector<8x64xf32>
    %123 = arith.truncf %122 : vector<8x64xf32> to vector<8x64xbf16>
    %c0_63 = arith.constant 0 : index
    %c0_64 = arith.constant 0 : index
    %124 = vector.load %arg11[%c0_63, %c0_64] : memref<64x32xbf16, #tpu.memory_space<vmem>>, vector<64x32xbf16>
    %cst_65 = arith.constant dense<0.000000e+00> : vector<8x32xf32>
    %125 = tpu.matmul %123, %124, %cst_65 {dimension_numbers = #tpu.dot_dimension_numbers<[1], [0], [0], [1], [0, 0, 1, 1], [], []>} : vector<8x64xbf16>, vector<64x32xbf16>, vector<8x32xf32> -> vector<8x32xf32>
    %c0_66 = arith.constant 0 : index
    %c0_67 = arith.constant 0 : index
    %126 = vector.load %arg12[%c0_66, %c0_67] : memref<1x32xf32, #tpu.memory_space<vmem>>, vector<1x32xf32>
    %127 = vector.shape_cast %126 : vector<1x32xf32> to vector<32xf32>
    %128 = vector.shape_cast %127 : vector<32xf32> to vector<1x32xf32>
    %129 = vector.broadcast %128 : vector<1x32xf32> to vector<8x32xf32>
    %130 = arith.addf %125, %129 : vector<8x32xf32>
    %131 = arith.addf %106, %130 : vector<8x32xf32>
    %c0_68 = arith.constant 0 : index
    %c0_69 = arith.constant 0 : index
    %132 = vector.load %arg13[%c0_68, %c0_69] : memref<1x32xf32, #tpu.memory_space<vmem>>, vector<1x32xf32>
    %133 = vector.shape_cast %132 : vector<1x32xf32> to vector<32xf32>
    %c0_70 = arith.constant 0 : index
    %c0_71 = arith.constant 0 : index
    %134 = vector.load %arg14[%c0_70, %c0_71] : memref<1x32xf32, #tpu.memory_space<vmem>>, vector<1x32xf32>
    %135 = vector.shape_cast %134 : vector<1x32xf32> to vector<32xf32>
    %cst_72 = arith.constant dense<0.000000e+00> : vector<8xf32>
    %136 = vector.multi_reduction <add>, %131, %cst_72 [1] : vector<8x32xf32> to vector<8xf32>
    %137 = vector.shape_cast %136 : vector<8xf32> to vector<8x1xf32>
    %cst_73 = arith.constant 3.200000e+01 : f32
    %138 = vector.broadcast %cst_73 : f32 to vector<8x1xf32>
    %139 = arith.divf %137, %138 : vector<8x1xf32>
    %140 = vector.broadcast %139 : vector<8x1xf32> to vector<8x32xf32>
    %141 = arith.subf %131, %140 : vector<8x32xf32>
    %142 = arith.mulf %141, %141 : vector<8x32xf32>
    %cst_74 = arith.constant dense<0.000000e+00> : vector<8xf32>
    %143 = vector.multi_reduction <add>, %142, %cst_74 [1] : vector<8x32xf32> to vector<8xf32>
    %144 = vector.shape_cast %143 : vector<8xf32> to vector<8x1xf32>
    %cst_75 = arith.constant 3.200000e+01 : f32
    %145 = vector.broadcast %cst_75 : f32 to vector<8x1xf32>
    %146 = arith.divf %144, %145 : vector<8x1xf32>
    %cst_76 = arith.constant 9.99999974E-6 : f32
    %147 = vector.broadcast %cst_76 : f32 to vector<8x1xf32>
    %148 = arith.addf %146, %147 : vector<8x1xf32>
    %149 = math.rsqrt %148 : vector<8x1xf32>
    %150 = vector.broadcast %149 : vector<8x1xf32> to vector<8x32xf32>
    %151 = arith.mulf %141, %150 : vector<8x32xf32>
    %152 = vector.shape_cast %133 : vector<32xf32> to vector<1x32xf32>
    %153 = vector.broadcast %152 : vector<1x32xf32> to vector<8x32xf32>
    %154 = arith.mulf %151, %153 : vector<8x32xf32>
    %155 = vector.shape_cast %135 : vector<32xf32> to vector<1x32xf32>
    %156 = vector.broadcast %155 : vector<1x32xf32> to vector<8x32xf32>
    %157 = arith.addf %154, %156 : vector<8x32xf32>
    %c0_77 = arith.constant 0 : index
    %c0_78 = arith.constant 0 : index
    %c0_79 = arith.constant 0 : index
    %158 = vector.load %arg15[%c0_77, %c0_78, %c0_79] : memref<1x8x32xf32, #tpu.memory_space<vmem>>, vector<1x8x32xf32>
    %159 = vector.shape_cast %158 : vector<1x8x32xf32> to vector<8x32xf32>
    %160 = vector.shape_cast %157 : vector<8x32xf32> to vector<1x8x32xf32>
    tpu.vector_store %arg15[%c0_77, %c0_78, %c0_79], %160 {strides = array<i32>} : memref<1x8x32xf32, #tpu.memory_space<vmem>>, vector<1x8x32xf32>,
    return
  }
  func.func @transform_0(%arg0: i32, %arg1: i32) -> (i32, i32, i32) {
    %c0_i32 = arith.constant 0 : i32
    %c0_i32_0 = arith.constant 0 : i32
    %c0_i32_1 = arith.constant 0 : i32
    return %arg0, %c0_i32, %c0_i32_0 : i32, i32, i32
  }
  func.func @transform_1(%arg0: i32, %arg1: i32) -> (i32, i32, i32) {
    %c0_i32 = arith.constant 0 : i32
    %c0_i32_0 = arith.constant 0 : i32
    %c0_i32_1 = arith.constant 0 : i32
    %c0_i32_2 = arith.constant 0 : i32
    return %c0_i32, %c0_i32_0, %c0_i32_1 : i32, i32, i32
  }
  func.func @transform_2(%arg0: i32, %arg1: i32) -> (i32, i32, i32) {
    %c0_i32 = arith.constant 0 : i32
    %c0_i32_0 = arith.constant 0 : i32
    %c0_i32_1 = arith.constant 0 : i32
    %c0_i32_2 = arith.constant 0 : i32
    return %c0_i32, %c0_i32_0, %c0_i32_1 : i32, i32, i32
  }
  func.func @transform_3(%arg0: i32, %arg1: i32) -> (i32, i32, i32) {
    %c0_i32 = arith.constant 0 : i32
    %c0_i32_0 = arith.constant 0 : i32
    %c0_i32_1 = arith.constant 0 : i32
    %c0_i32_2 = arith.constant 0 : i32
    return %c0_i32, %c0_i32_0, %c0_i32_1 : i32, i32, i32
  }
  func.func @transform_4(%arg0: i32, %arg1: i32) -> (i32, i32, i32) {
    %c0_i32 = arith.constant 0 : i32
    %c0_i32_0 = arith.constant 0 : i32
    %c0_i32_1 = arith.constant 0 : i32
    %c0_i32_2 = arith.constant 0 : i32
    return %c0_i32, %c0_i32_0, %c0_i32_1 : i32, i32, i32
  }
  func.func @transform_5(%arg0: i32, %arg1: i32) -> (i32, i32) {
    %c0_i32 = arith.constant 0 : i32
    %c0_i32_0 = arith.constant 0 : i32
    %c0_i32_1 = arith.constant 0 : i32
    return %c0_i32, %c0_i32_0 : i32, i32
  }
  func.func @transform_6(%arg0: i32, %arg1: i32) -> (i32, i32) {
    %c0_i32 = arith.constant 0 : i32
    %c0_i32_0 = arith.constant 0 : i32
    %c0_i32_1 = arith.constant 0 : i32
    return %c0_i32, %c0_i32_0 : i32, i32
  }
  func.func @transform_7(%arg0: i32, %arg1: i32) -> (i32, i32) {
    %c0_i32 = arith.constant 0 : i32
    %c0_i32_0 = arith.constant 0 : i32
    %c0_i32_1 = arith.constant 0 : i32
    return %c0_i32, %c0_i32_0 : i32, i32
  }
  func.func @transform_8(%arg0: i32, %arg1: i32) -> (i32, i32) {
    %c0_i32 = arith.constant 0 : i32
    %c0_i32_0 = arith.constant 0 : i32
    %c0_i32_1 = arith.constant 0 : i32
    return %c0_i32, %c0_i32_0 : i32, i32
  }
  func.func @transform_9(%arg0: i32, %arg1: i32) -> (i32, i32) {
    %c0_i32 = arith.constant 0 : i32
    %c0_i32_0 = arith.constant 0 : i32
    %c0_i32_1 = arith.constant 0 : i32
    return %c0_i32, %c0_i32_0 : i32, i32
  }
  func.func @transform_10(%arg0: i32, %arg1: i32) -> (i32, i32) {
    %c0_i32 = arith.constant 0 : i32
    %c0_i32_0 = arith.constant 0 : i32
    %c0_i32_1 = arith.constant 0 : i32
    return %c0_i32, %c0_i32_0 : i32, i32
  }
  func.func @transform_11(%arg0: i32, %arg1: i32) -> (i32, i32) {
    %c0_i32 = arith.constant 0 : i32
    %c0_i32_0 = arith.constant 0 : i32
    %c0_i32_1 = arith.constant 0 : i32
    return %c0_i32, %c0_i32_0 : i32, i32
  }
  func.func @transform_12(%arg0: i32, %arg1: i32) -> (i32, i32) {
    %c0_i32 = arith.constant 0 : i32
    %c0_i32_0 = arith.constant 0 : i32
    %c0_i32_1 = arith.constant 0 : i32
    return %c0_i32, %c0_i32_0 : i32, i32
  }
  func.func @transform_13(%arg0: i32, %arg1: i32) -> (i32, i32, i32) {
    %c0_i32 = arith.constant 0 : i32
    %c0_i32_0 = arith.constant 0 : i32
    return %arg0, %arg1, %c0_i32 : i32, i32, i32
  }
}

</mosaic_0001>

<bundles_post_ra>
// kernel: tpu_custom_call.1
= control target key start
LH: loop header
LB: loop body
LE: loop exit
PB: predicated region body
PF: predicated region fallthrough
CT: control target
= control target key end

     0   :  { %s2181_s0 = inlined_call_operand.vmem [shape: f32[2,8,32], index: 0, kind: input, shape index: {}]   ;;  %s2182_s1 = inlined_call_operand.vmem [shape: bf16[2,32,16], index: 1, kind: input, shape index: {}]   ;;  %s2183_s2 = inlined_call_operand.vmem [shape: bf16[2,32,16], index: 2, kind: input, shape index: {}]   ;;  %s2184_s3 = inlined_call_operand.vmem [shape: bf16[2,32,16], index: 3, kind: input, shape index: {}]   ;;  %s2185_s4 = inlined_call_operand.vmem [shape: bf16[2,16,32], index: 4, kind: input, shape index: {}]   ;;  %s2186_s5 = inlined_call_operand.vmem [shape: f32[1,32], index: 5, kind: input, shape index: {}]   ;;  %s2187_s6 = inlined_call_operand.vmem [shape: f32[1,32], index: 6, kind: input, shape index: {}]   ;;  %s2188_s7 = inlined_call_operand.vmem [shape: bf16[32,64], index: 7, kind: input, shape index: {}]   ;;  %s2189_s8 = inlined_call_operand.vmem [shape: f32[1,64], index: 8, kind: input, shape index: {}]   ;;  %s2190_s9 = inlined_call_operand.vmem [shape: bf16[64,32], index: 9, kind: input, shape index: {}]   ;;  %s2191_s10 = inlined_call_operand.vmem [shape: f32[1,32], index: 10, kind: input, shape index: {}]   ;;  %s2192_s11 = inlined_call_operand.vmem [shape: f32[1,32], index: 11, kind: input, shape index: {}]   ;;  %s2193_s12 = inlined_call_operand.vmem [shape: f32[1,32], index: 12, kind: input, shape index: {}]   ;;  %s2194_s13 = inlined_call_operand.hbm [shape: f32[2,8,32], index: 13, kind: output, shape index: {}]  }
   0x1   :  { %2195 = sst [smem:[#allocation5_spill]] %s2181_s0 }
   0x2   :  { %2196 = sst [smem:[#allocation6_spill]] %s2182_s1 }
   0x3   :  { %2197 = sst [smem:[#allocation7_spill]] %s2183_s2 }
   0x4   :  { %2198 = sst [smem:[#allocation8_spill]] %s2184_s3 }
   0x5   :  { %2199 = sst [smem:[#allocation9_spill]] %s2185_s4 }
   0x6   :  { %18 = vsyncpa [#allocation3], 0 }
   0x7   :  { %20 = vsyncpa [#allocation3 + $0x1], 0  ;;  %s1888_s25 = smov 0   ;;  %s1890_s26 = smov 0  }
   0x8   :  { %s1892_s27 = smov 0   ;;  %s1894_s28 = smov 0  }
   0x9   :  { %s1896_s29 = smov 0   ;;  %s1898_s30 = smov 0  }
   0xa LB: > { %s1437_s14 = sadd.s32 4294967295, %s1813_s30   ;;  %s1438_s15 = sadd.s32 4294967294, %s1813_s30   ;;  %s1813_s30 = sphi %s1898_s30, %s26_s30   ;;  %s1809_s29 = sphi %s1896_s29, %s2211_s29   ;;  %s1805_s28 = sphi %s1894_s28, %s2210_s28   ;;  %s1801_s27 = sphi %s1892_s27, %s2209_s27   ;;  %s1797_s26 = sphi %s1890_s26, %s2208_s26   ;;  %s1793_s25 = sphi %s1888_s25, %s2207_s25  }
   0xb   : > { %s38_s16 = sadd.s32 1, %s1809_s29  ;;  %s325_s17 = sadd.s32 1, %s1801_s27 }
   0xc   : > { %p40_p0 = scmp.ge.s32.totalorder %s38_s16, 2  ;;  %p335_p1 = scmp.ne.s32.totalorder %s1801_s27, %s1797_s26 }
   0xd   : > { %p336_p2 = scmp.eq.s32.totalorder %s1437_s14, 1  ;;  %p341_p3 = scmp.ne.s32.totalorder %s1797_s26, %s1793_s25 }
   0xe   : > { %s2213_s16 = smov (%p40_p0, %s38_s16), 0  ;;  %p342_p5 = scmp.eq.s32.totalorder %s1438_s15, 1 }
   0xf   : > { %p1928_p4 = por %p336_p2, %p335_p1  ;;  %s320_s19 = ssub.s32 %s1809_s29, %s2213_s16 }
  0x10   : > { %p1441_p6 = scmp.ge.s32.totalorder %s1813_s30, 1  ;;  %p323_p7 = scmp.eq.s32.totalorder %s320_s19, 0 }
  0x11   : > { %p1935_p8 = por %p342_p5, %p341_p3  ;;  %p403_p9 = scmp.lt.s32.totalorder %s1813_s30, 3 }
  0x12   : > { %s1941_s21 = scalar_select %p323_p7, %s1801_s27, %s325_s17  }
  0x13   : > { %p404_p10 = pnand %p1441_p6, %p403_p9 }
  0x14   : > { %s2202_s2 = sld [smem:[#allocation7_spill]] (!%p404_p10)  ;;  %v1815_v1 = vmov (!%p404_p10), 0.0   ;;  %s2203_s1 = sld [smem:[#allocation6_spill]] (!%p404_p10)  ;;  %vm1816_vm0 = vmmov (!%p404_p10), 0   ;;  %vm480_vm1 = vcmask (!%p404_p10), 261120   ;;  %vm641_vm2 = vcmask (!%p404_p10), 130048  }
  0x15   : > { %407 = sbr.rel (%p404_p10) target bundleno = 3066 (0xbfa), region = 72  ;;  %1548 = vmatprep.subr.bf16.mxu1 (!%p404_p10), %v1815_v1  ;;  %1540 = vmatprep.subr.bf16.mxu0 (!%p404_p10), %v1815_v1  ;;  %p446_p11 = scmp.lt.s32.totalorder (!%p404_p10), %s1805_s28, 1  ;;  %v457_v20 = vlaneseq (!%p404_p10)  ;;  %vm689_vm4 = vcmask (!%p404_p10), 64512   ;;  %vm706_vm5 = vcmask (!%p404_p10), 1043456   ;;  %vm1277_vm6 = vcmask (!%p404_p10), 523264  }
  0x16   : > { %1552 = vmatprep.mubr.msk.bf16.mxu1 (!%p404_p10), %vm1816_vm0, %v1815_v1  ;;  %1544 = vmatprep.mubr.msk.bf16.mxu0 (!%p404_p10), %vm1816_vm0, %v1815_v1  ;;  %s2204_s0 = sld [smem:[#allocation5_spill]] (!%p404_p10)  ;;  %s2205_s3 = sld [smem:[#allocation8_spill]] (!%p404_p10) }
  0x17   : > { %v2001_v21 = vshrl.u32 (!%p404_p10), %v457_v20, 7  ;;  %v2003_v22 = vand.u32 (!%p404_p10), 127, %v457_v20  ;;  %s2206_s4 = sld [smem:[#allocation9_spill]] (!%p404_p10)  ;;  %s1499_s23 = sshll.u32 (!%p404_p10), %s1805_s28, 7 }
  0x19   : > { %vm463_vm3 = vcmp.le.s32.totalorder (!%p404_p10), %v2003_v22, %v2001_v21 }
  0x1a   : > { %v1701_v0 = vld [vmem:[%s2202_s2] sm:$0xff] (!%p404_p10)   ;;  %v1702_v2 = vld [vmem:[%s2202_s2 + $0x8] sm:$0xff] (!%p404_p10)   ;;  %v1709_v40 = vld [vmem:[%s2203_s1 + $0x10] sm:$0xff] (!%p404_p10)  }
  0x1b   : > { %1549 = vmatpush3.bf16.msra.mxu1 (!%p404_p10), %v1701_v0  ;;  %v1703_v3 = vld [vmem:[%s2203_s1] sm:$0xff] (!%p404_p10)   ;;  %v1704_v4 = vld [vmem:[%s2203_s1 + $0x8] sm:$0xff] (!%p404_p10)   ;;  %v1710_v41 = vld [vmem:[%s2203_s1 + $0x18] sm:$0xff] (!%p404_p10)  }
  0x1c   : > { %1550 = vmatprep.subr.bf16.mxu1 %v1815_v1  ;;  %1541 = vmatpush3.bf16.msra.mxu0 %v1703_v3  ;;  %s447_s19 = scalar_select %p446_p11, %s1805_s28, 1  ;;  %v1705_v18 = vld [vmem:[%s2205_s3] sm:$0xff]   ;;  %v1706_v19 = vld [vmem:[%s2205_s3 + $0x8] sm:$0xff]   ;;  %v1707_v45 = vld [vmem:[%s2202_s2 + $0x10] sm:$0xff]  }
  0x1d   : > { %1542 = vmatprep.subr.bf16.mxu0 %v1815_v1  ;;  %v1708_v47 = vld [vmem:[%s2202_s2 + $0x18] sm:$0xff]   ;;  %v1711_v63 = vld [vmem:[%s2205_s3 + $0x10] sm:$0xff]   ;;  %v1714_v20 = vld [vmem:[%s2206_s4 + $0x8] sm:$0xff]   ;;  %s1817_s28 = smov [#allocation2]  }
  0x1e   : > { %s1443_s24 = sshll.u32 %s447_s19, 3  ;;  %v1712_v0 = vld [vmem:[%s2205_s3 + $0x18] sm:$0xff]  }
  0x1f   : > { %1551 = vmatpush3.bf16.msra.mxu1 %v1702_v2  ;;  %s449_s17 = scalar_lea.vmem %s2204_s0, %s1443_s24  ;;  %s443_s0 = sand.u32 1, %s1797_s26  }
  0x20   : > { %1564 = vmatprep.subr.bf16.mxu1 %v1815_v1  ;;  %v1969_v5 = vld [vmem:[%s449_s17] sm:$0xff]  ;;  %1543 = vmatpush3.bf16.msra.mxu0 %v1704_v4  ;;  %s1442_s14 = sshll.u32 %s443_s0, 3  ;;  %s1353_s15 = scalar_lea.sflag [#allocation3], %s443_s0 }
  0x21   : > { %v1973_v6 = vpack.c.bf16 %v1969_v5, %v1969_v5  ;;  %1556 = vmatprep.subr.bf16.mxu0 %v1815_v1  ;;  %s445_s24 = scalar_lea.vmem [#allocation2], %s1442_s14  ;;  %s1739_s14 = sshll.u32 %s1817_s28, 4  ;;  %s1740_s14 = int_to_ptr.vmem [resolvable:$false] %s1739_s14 }
  0x22   : > { %s1367_s1 = sshll.u32 %s445_s24, 4  ;;  %s1741_s19 = scalar_lea.vmem %s1740_s14, 256  ;;  %s2135_s1 = int_to_ptr.vmem [resolvable:$true] %s1367_s1 }
  0x23   : > { %1553 = vmatmul.mubr.msk.bf16.vlgmr.msra.gmra.mrb[0].mxu1 %vm480_vm1, %v1973_v6  ;;  %1545 = vmatmul.mubr.msk.bf16.vlgmr.msra.gmra.mrb[0].mxu0 %vm480_vm1, %v1973_v6  ;;  %s1735_s17 = scalar_lea.vmem %s2135_s1, 128  ;;  %p1742_p1 = scmp.lt.s32.totalorder %s2135_s1, %s1740_s14 }
  0x24   : > { %1566 = vmatprep.mubr.msk.bf16.mxu1 %vm1816_vm0, %v1815_v1  ;;  %1560 = vmatprep.mubr.msk.bf16.mxu0 %vm1816_vm0, %v1815_v1  ;;  %p1736_p12 = scmp.ne.s32.totalorder %s2135_s1, %s1735_s17  ;;  %p1743_p2 = scmp.lt.s32.totalorder %s1741_s19, %s1735_s17 }
  0x25   : > { %1557 = vmatpush3.bf16.msra.mxu0 %v1705_v18 }
  0x26   : > { %1558 = vmatprep.subr.bf16.mxu0 %v1815_v1  ;;  %p1737_p13 = pnand %p1736_p12, %p1928_p4  ;;  %p1744_p3 = por %p1743_p2, %p1742_p1 }
  0x28   : > { %p1738_p0 = pneg %p1737_p13 }
  0x29   : > { %1559 = vmatpush3.bf16.msra.mxu0 %v1706_v19 }
  0x2a   : > { %1570 = vmatprep.subr.bf16.mxu0 %v1815_v1  ;;  %p1745_p5 = pnand %p1744_p3, %p1738_p0 }
  0x2c   : > { %1561 = vmatmul.mubr.msk.bf16.vlgmr.msra.gmra.mrb[4].mxu0 %vm480_vm1, %v1973_v6 }
  0x2d   : > { %1572 = vmatprep.mubr.msk.bf16.mxu0 %vm1816_vm0, %v1815_v1 }
  0xf6   : > { %v577_v7 = vpop.f32.mrb[0].mxu1  ;;  %v518_v8 = vpop.f32.mrb[0].mxu0 }
  0xf7   : > { %v640_v9 = vpack.c.bf16 %v577_v7, %v577_v7  ;;  %v1554_v10 = vpop.f32.mrb[1].mxu1  ;;  %v1546_v11 = vpop.f32.mrb[1].mxu0  ;;  %v639_v17 = vpack.c.bf16 %v518_v8, %v518_v8 }
  0xf8   : > { %v580_v12 = vpop.f32.mrb[2].mxu1  ;;  %v521_v13 = vpop.f32.mrb[2].mxu0 }
  0xf9   : > { %v646_v14 = vsel %vm641_vm2, %v640_v9, 0  ;;  %v1555_v15 = vpop.f32.mrb[3].mxu1  ;;  %v1547_v16 = vpop.f32.mrb[3].mxu0 }
  0xfa   : > { %1565 = vmatpush3.bf16.xpose.msra.mxu1 %v646_v14 }
  0xfb   : > { %1576 = vmatprep.subr.bf16.mxu1 %v1815_v1 }
  0xff   : > { %v633_v34 = vpop.f32.mrb[4].mxu0 }
 0x100   : > { %v1562_v35 = vpop.f32.mrb[5].mxu0  ;;  %v702_v38 = vpack.c.bf16 %v633_v34, %v633_v34 }
 0x101   : > { %1567 = vmatmul.mubr.msk.bf16.vlgmr.msra.gmra.mrb[4].mxu1 %vm641_vm2, %v639_v17  ;;  %v636_v36 = vpop.f32.mrb[6].mxu0 }
 0x102   : > { %1580 = vmatprep.mubr.msk.bf16.mxu1 %vm1816_vm0, %v1815_v1  ;;  %v1563_v37 = vpop.f32.mrb[7].mxu0  ;;  %v708_v39 = vsel %vm706_vm5, %v702_v38, 0  ;;  %1577 = vmatpush3.bf16.msra.mxu1 %v1709_v40 }
 0x103   : > { %1571 = vmatpush3.bf16.msra.mxu0 %v708_v39  ;;  %1578 = vmatprep.subr.bf16.mxu1 %v1815_v1 }
 0x104   : > { %1584 = vmatprep.subr.bf16.mxu0 %v1815_v1 }
 0x106   : > { %1579 = vmatpush3.bf16.msra.mxu1 %v1710_v41 }
 0x107   : > { %1592 = vmatprep.subr.bf16.mxu1 %v1815_v1 }
 0x109   : > { %1581 = vmatmul.mubr.msk.bf16.vlgmr.msra.gmra.mrb[8].mxu1 %vm480_vm1, %v1973_v6 }
 0x10a   : > { %1596 = vmatprep.mubr.msk.bf16.mxu1 %vm1816_vm0, %v1815_v1  ;;  %1593 = vmatpush3.bf16.msra.mxu1 %v1711_v63  ;;  %v1486_v63 = vld [vmem:[%s2189_s8] ss:$0 sm:$0xff] }
 0x10b   : > { %1594 = vmatprep.subr.bf16.mxu1 %v1815_v1 }
 0x10e   : > { %1595 = vmatpush3.bf16.msra.mxu1 %v1712_v0 }
 0x10f   : > { %1606 = vmatprep.subr.bf16.mxu1 %v1815_v1 }
 0x111   : > { %1597 = vmatmul.mubr.msk.bf16.vlgmr.msra.gmra.mrb[12].mxu1 %vm480_vm1, %v1973_v6 }
 0x112   : > { %1608 = vmatprep.mubr.msk.bf16.mxu1 %vm1816_vm0, %v1815_v1 }
 0x1d4   : > { %v682_v23 = vpop.f32.mrb[4].mxu1 }
 0x1d5   : > { %v688_v24 = vsel %vm463_vm3, %v682_v23, -1e+30  ;;  %v1568_v25 = vpop.f32.mrb[5].mxu1 }
 0x1d6   : > { %v685_v26 = vpop.f32.mrb[6].mxu1  ;;  %v690_v27 = vsel %vm689_vm4, %v688_v24, -inf }
 0x1d7   : > { %691 = vmax.xlane.f32.xlu0 %v690_v27  ;;  %v1569_v28 = vpop.f32.mrb[7].mxu1 }
 0x1dc   : > { %v804_v48 = vpop.f32.mrb[8].mxu1 }
 0x1dd   : > { %v1582_v49 = vpop.f32.mrb[9].mxu1  ;;  %v924_v62 = vpack.c.bf16 %v804_v48, %v804_v48  ;;  %v1715_v48 = vld [vmem:[%s2188_s7] sm:$0xff]  }
 0x1de   : > { %v807_v50 = vpop.f32.mrb[10].mxu1 }
 0x1df   : > { %v1583_v51 = vpop.f32.mrb[11].mxu1 }
 0x1e4   : > { %v918_v14 = vpop.f32.mrb[12].mxu1 }
 0x1e5   : > { %v1598_v15 = vpop.f32.mrb[13].mxu1  ;;  %v985_v18 = vpack.c.bf16 %v918_v14, %v918_v14 }
 0x1e6   : > { %v921_v16 = vpop.f32.mrb[14].mxu1 }
 0x1e7   : > { %v1599_v17 = vpop.f32.mrb[15].mxu1  ;;  %v990_v19 = vsel %vm706_vm5, %v985_v18, 0 }
 0x1e8   : > { %1607 = vmatpush3.bf16.msra.mxu1 %v990_v19 }
 0x1e9   : > { %1618 = vmatprep.subr.bf16.mxu1 %v1815_v1 }
 0x264   : > { %v692_v29 = vpop.xlane.xlu0 %691 }
 0x265   : > { %v693_v30 = vsub.f32 %v688_v24, %v692_v29  ;;  %v1713_v24 = vld [vmem:[%s2206_s4] sm:$0xff]   ;;  %s2133_s4 = scalar_lea.hbm %s2194_s13, %s1499_s23 }
 0x267   : > { %v694_v31 = vmul.f32 1.442695, %v693_v30 }
 0x269   : > { %1721 = vpow2.f32 %v694_v31 }
 0x273   : > { %v1722_v32 = vpop.eup %1721 }
 0x274   : > { %v696_v33 = vsel %vm689_vm4, %v1722_v32, 0.0 }
 0x275   : > { %697 = vadd.xlane.f32.xlu0 %v696_v33 }
 0x302   : > { %v698_v42 = vpop.xlane.xlu0 %697 }
 0x303   : > { %1723 = vrcp.f32 %v698_v42 }
 0x30d   : > { %v1724_v43 = vpop.eup %1723 }
 0x30e   : > { %v700_v44 = vmul.f32 %v1724_v43, %v1722_v32 }
 0x310   : > { %v701_v46 = vpack.c.bf16 %v700_v44, %v700_v44 }
 0x312   : > { %1573 = vmatmul.mubr.msk.bf16.vlgmr.msra.gmra.mrb[8].mxu0 %vm689_vm4, %v701_v46 }
 0x313   : > { %1585 = vmatpush3.bf16.msra.mxu0 %v1707_v45  ;;  %1588 = vmatprep.mubr.msk.bf16.mxu0 %vm1816_vm0, %v1815_v1 }
 0x314   : > { %1586 = vmatprep.subr.bf16.mxu0 %v1815_v1 }
 0x317   : > { %1587 = vmatpush3.bf16.msra.mxu0 %v1708_v47 }
 0x318   : > { %1600 = vmatprep.subr.bf16.mxu0 %v1815_v1 }
 0x31a   : > { %1589 = vmatmul.mubr.msk.bf16.vlgmr.msra.gmra.mrb[12].mxu0 %vm480_vm1, %v1973_v6 }
 0x31b   : > { %1602 = vmatprep.mubr.msk.bf16.mxu0 %vm1816_vm0, %v1815_v1 }
 0x3e5   : > { %v744_v52 = vpop.f32.mrb[8].mxu0 }
 0x3e6   : > { %v1574_v53 = vpop.f32.mrb[9].mxu0  ;;  %v750_v26 = vpack.c.bf16 %v744_v52, %v744_v52 }
 0x3e7   : > { %v747_v54 = vpop.f32.mrb[10].mxu0  ;;  %v1484_v53 = vld [vmem:[%s2186_s5] ss:$0 sm:$0xff] }
 0x3e8   : > { %v1575_v55 = vpop.f32.mrb[11].mxu0 }
 0x3e9   : > { %v1485_v55 = vld [vmem:[%s2187_s6] ss:$0 sm:$0xff] }
 0x3ed   : > { %v861_v56 = vpop.f32.mrb[12].mxu0 }
 0x3ee   : > { %v925_v57 = vpack.c.bf16 %v861_v56, %v861_v56  ;;  %v1590_v58 = vpop.f32.mrb[13].mxu0 }
 0x3ef   : > { %v864_v59 = vpop.f32.mrb[14].mxu0 }
 0x3f0   : > { %v930_v60 = vsel %vm641_vm2, %v925_v57, 0  ;;  %v1591_v61 = vpop.f32.mrb[15].mxu0  ;;  %v1717_v59 = vld [vmem:[%s2190_s9] sm:$0xff]  }
 0x3f1   : > { %1601 = vmatpush3.bf16.xpose.msra.mxu0 %v930_v60  ;;  %v1718_v60 = vld [vmem:[%s2190_s9 + $0x8] sm:$0xff]   ;;  %v1719_v61 = vld [vmem:[%s2190_s9 + $0x10] sm:$0xff]  }
 0x3f2   : > { %1612 = vmatprep.subr.bf16.mxu0 %v1815_v1 }
 0x3f8   : > { %1603 = vmatmul.mubr.msk.bf16.vlgmr.msra.gmra.mrb[16].mxu0 %vm641_vm2, %v924_v62  ;;  %v1720_v62 = vld [vmem:[%s2190_s9 + $0x18] sm:$0xff]  }
 0x3f9   : > { %1614 = vmatprep.mubr.msk.bf16.mxu0 %vm1816_vm0, %v1815_v1  ;;  %1613 = vmatpush3.bf16.msra.mxu0 %v1714_v20 }
 0x3fa   : > { %1624 = vmatprep.subr.bf16.mxu0 %v1815_v1 }
 0x4cb   : > { %v966_v2 = vpop.f32.mrb[16].mxu0 }
 0x4cc   : > { %v972_v3 = vsel %vm463_vm3, %v966_v2, -1e+30  ;;  %v1604_v4 = vpop.f32.mrb[17].mxu0 }
 0x4cd   : > { %v969_v7 = vpop.f32.mrb[18].mxu0  ;;  %v973_v8 = vsel %vm689_vm4, %v972_v3, -inf }
 0x4ce   : > { %974 = vmax.xlane.f32.xlu1 %v973_v8  ;;  %v1605_v9 = vpop.f32.mrb[19].mxu0 }
 0x55b   : > { %v975_v10 = vpop.xlane.xlu1 %974 }
 0x55c   : > { %v976_v11 = vsub.f32 %v972_v3, %v975_v10 }
 0x55e   : > { %v977_v12 = vmul.f32 1.442695, %v976_v11 }
 0x560   : > { %1725 = vpow2.f32 %v977_v12 }
 0x56a   : > { %v1726_v13 = vpop.eup %1725 }
 0x56b   : > { %v979_v6 = vsel %vm689_vm4, %v1726_v13, 0.0 }
 0x56c   : > { %980 = vadd.xlane.f32.xlu1 %v979_v6 }
 0x5f9   : > { %v981_v21 = vpop.xlane.xlu1 %980 }
 0x5fa   : > { %1727 = vrcp.f32 %v981_v21 }
 0x604   : > { %v1728_v22 = vpop.eup %1727 }
 0x605   : > { %v983_v23 = vmul.f32 %v1728_v22, %v1726_v13  ;;  %v1490_v13 = vld [vmem:[%s2191_s10] ss:$0 sm:$0xff] }
 0x607   : > { %v984_v25 = vpack.c.bf16 %v983_v23, %v983_v23 }
 0x609   : > { %1609 = vmatmul.mubr.msk.bf16.vlgmr.msra.gmra.mrb[16].mxu1 %vm689_vm4, %v984_v25 }
 0x60a   : > { %1619 = vmatpush3.bf16.msra.mxu1 %v1713_v24  ;;  %1620 = vmatprep.mubr.msk.bf16.mxu1 %vm1816_vm0, %v1815_v1 }
 0x60b   : > { %1632 = vmatprep.subr.bf16.mxu1 %v1815_v1 }
 0x611   : > { %1621 = vmatmul.mubr.msk.bf16.vlgmr.msra.gmra.mrb[20].mxu1 %vm641_vm2, %v750_v26 }
 0x612   : > { %1640 = vmatprep.mubr.msk.bf16.mxu1 %vm1816_vm0, %v1815_v1  ;;  %1633 = vmatpush3.bf16.msra.mxu1 %v1717_v59 }
 0x613   : > { %1634 = vmatprep.subr.bf16.mxu1 %v1815_v1 }
 0x616   : > { %1635 = vmatpush3.bf16.msra.mxu1 %v1718_v60 }
 0x617   : > { %1636 = vmatprep.subr.bf16.mxu1 %v1815_v1 }
 0x61a   : > { %1637 = vmatpush3.bf16.msra.mxu1 %v1719_v61 }
 0x61b   : > { %1638 = vmatprep.subr.bf16.mxu1 %v1815_v1 }
 0x61e   : > { %1639 = vmatpush3.bf16.msra.mxu1 %v1720_v62 }
 0x6dc   : > { %v1026_v27 = vpop.f32.mrb[16].mxu1 }
 0x6dd   : > { %v1032_v28 = vpack.c.bf16 %v1026_v27, %v1026_v27  ;;  %v1610_v29 = vpop.f32.mrb[17].mxu1 }
 0x6de   : > { %v1029_v30 = vpop.f32.mrb[18].mxu1  ;;  %v1496_v29 = vld [vmem:[%s2192_s11] ss:$0 sm:$0xff] }
 0x6df   : > { %v1611_v31 = vpop.f32.mrb[19].mxu1  ;;  %1615 = vmatmul.mubr.msk.bf16.vlgmr.msra.gmra.mrb[20].mxu0 %vm641_vm2, %v1032_v28 }
 0x6e0   : > { %1628 = vmatprep.mubr.msk.bf16.mxu0 %vm1816_vm0, %v1815_v1  ;;  %1625 = vmatpush3.bf16.msra.mxu0 %v1715_v48  ;;  %v1497_v31 = vld [vmem:[%s2193_s12] ss:$0 sm:$0xff] }
 0x6e1   : > { %1626 = vmatprep.subr.bf16.mxu0 %v1815_v1 }
 0x6e4   : > { %v1128_v32 = vpop.f32.mrb[20].mxu1 }
 0x6e5   : > { %v1622_v33 = vpop.f32.mrb[21].mxu1 }
 0x6e6   : > { %v1131_v34 = vpop.f32.mrb[22].mxu1 }
 0x6e7   : > { %v1623_v35 = vpop.f32.mrb[23].mxu1 }
 0x7b2   : > { %v1079_v36 = vpop.f32.mrb[20].mxu0 }
 0x7b3   : > { %v1129_v37 = vadd.f32 %v1128_v32, %v1079_v36  ;;  %v1616_v38 = vpop.f32.mrb[21].mxu0 }
 0x7b4   : > { %v1082_v39 = vpop.f32.mrb[22].mxu0 }
 0x7b5   : > { %v1617_v40 = vpop.f32.mrb[23].mxu0  ;;  %v1134_v41 = vadd.f32 %v1129_v37, %v1969_v5  ;;  %v1716_v5 = vld [vmem:[%s2188_s7 + $0x8] sm:$0xff]  }
 0x7b6   : > { %1627 = vmatpush3.bf16.msra.mxu0 %v1716_v5 }
 0x7b7   : > { %v1137_v42 = vsel %vm480_vm1, %v1134_v41, 0.0 }
 0x7b8   : > { %1138 = vadd.xlane.f32.xlu0 %v1137_v42 }
 0x845   : > { %v1139_v43 = vpop.xlane.xlu0 %1138 }
 0x846   : > { %v1141_v44 = vmul.f32 0.03125, %v1139_v43 }
 0x848   : > { %v1142_v45 = vsub.f32 %v1134_v41, %v1141_v44 }
 0x84a   : > { %v1143_v46 = vmul.f32 %v1142_v45, %v1142_v45 }
 0x84c   : > { %v1144_v47 = vsel %vm480_vm1, %v1143_v46, 0.0 }
 0x84d   : > { %1145 = vadd.xlane.f32.xlu1 %v1144_v47 }
 0x8da   : > { %v1146_v49 = vpop.xlane.xlu1 %1145 }
 0x8db   : > { %v1147_v50 = vmul.f32 0.03125, %v1146_v49 }
 0x8dd   : > { %v1148_v51 = vadd.f32 1e-05, %v1147_v50 }
 0x8df   : > { %1729 = vrsqrt.f32 %v1148_v51 }
 0x8e9   : > { %v1730_v52 = vpop.eup %1729 }
 0x8ea   : > { %v1150_v54 = vmul.f32 %v1730_v52, %v1142_v45 }
 0x8ec   : > { %v1157_v56 = vmul.f32 %v1484_v53, %v1150_v54 }
 0x8ee   : > { %v1164_v57 = vadd.f32 %v1485_v55, %v1157_v56 }
 0x8f0   : > { %v1165_v58 = vpack.c.bf16 %v1164_v57, %v1164_v57 }
 0x8f2   : > { %1629 = vmatmul.mubr.msk.bf16.vlgmr.msra.gmra.mrb[24].mxu0 %vm480_vm1, %v1165_v58 }
 0x9c5   : > { %v1226_v0 = vpop.f32.mrb[24].mxu0 }
 0x9c6   : > { %v1227_v2 = vadd.f32 %v1486_v63, %v1226_v0  ;;  %v1630_v3 = vpop.f32.mrb[25].mxu0 }
 0x9c7   : > { %v1229_v4 = vpop.f32.mrb[26].mxu0 }
 0x9c8   : > { %v1233_v7 = vmul.f32 0.70710677, %v1227_v2  ;;  %v1631_v8 = vpop.f32.mrb[27].mxu0  ;;  %v1232_v10 = vmul.f32 0.5, %v1227_v2 }
 0x9ca   : > { %1731 = verf.f32 %v1233_v7 }
 0x9d4   : > { %v1732_v9 = vpop.eup %1731 }
 0x9d5   : > { %v1235_v11 = vadd.f32 1.0, %v1732_v9 }
 0x9d7   : > { %v1236_v1 = vmul.f32 %v1235_v11, %v1232_v10 }
 0x9d9   : > { %v1237_v12 = vpack.c.bf16 %v1236_v1, %v1236_v1 }
 0x9db   : > { %1641 = vmatmul.mubr.msk.bf16.vlgmr.msra.gmra.mrb[24].mxu1 %vm1277_vm6, %v1237_v12 }
 0xaae   : > { %v1315_v6 = vpop.f32.mrb[24].mxu1 }
 0xaaf   : > { %v1316_v14 = vadd.f32 %v1490_v13, %v1315_v6  ;;  %v1642_v15 = vpop.f32.mrb[25].mxu1 }
 0xab0   : > { %v1318_v16 = vpop.f32.mrb[26].mxu1 }
 0xab1   : > { %v1643_v17 = vpop.f32.mrb[27].mxu1  ;;  %v1321_v18 = vadd.f32 %v1316_v14, %v1164_v57 }
 0xab3   : > { %v1324_v19 = vsel %vm480_vm1, %v1321_v18, 0.0 }
 0xab4   : > { %1325 = vadd.xlane.f32.xlu0 %v1324_v19 }
 0xb41   : > { %v1326_v20 = vpop.xlane.xlu0 %1325 }
 0xb42   : > { %v1327_v21 = vmul.f32 0.03125, %v1326_v20 }
 0xb44   : > { %v1328_v22 = vsub.f32 %v1321_v18, %v1327_v21 }
 0xb46   : > { %v1329_v23 = vmul.f32 %v1328_v22, %v1328_v22 }
 0xb48   : > { %v1330_v24 = vsel %vm480_vm1, %v1329_v23, 0.0 }
 0xb49   : > { %1331 = vadd.xlane.f32.xlu1 %v1330_v24 }
 0xbd6   : > { %v1332_v25 = vpop.xlane.xlu1 %1331 }
 0xbd7   : > { %v1333_v26 = vmul.f32 0.03125, %v1332_v25 }
 0xbd9   : > { %v1334_v27 = vadd.f32 1e-05, %v1333_v26 }
 0xbdb   : > { %1733 = vrsqrt.f32 %v1334_v27 }
 0xbe5   : > { %v1734_v28 = vpop.eup %1733 }
 0xbe6   : > { %v1336_v30 = vmul.f32 %v1734_v28, %v1328_v22 }
 0xbe8   : > { %v1343_v32 = vmul.f32 %v1496_v29, %v1336_v30 }
 0xbea   : > { %v1350_v33 = vadd.f32 %v1497_v31, %v1343_v32 }
 0xbec   : > { %1351 = vst.msk [vmem:[%s445_s24] sm:$0xff] %vm480_vm1, %v1350_v33 }
 0xbed   : > { %1748 = shalt.err (!%p1745_p5)
}
 0xbee   : > { %s1749_s2 = scalar_lea.hbm %s2133_s4, 128  ;;  %s1753_s22 = scalar_lea.hbm %s2194_s13, 256 }
 0xbef   : > { %p1750_p6 = scmp.ne.s32.totalorder %s2133_s4, %s1749_s2  ;;  %p1754_p10 = scmp.lt.u32.totalorder %s2133_s4, %s2194_s13 }
 0xbf0   : > { %p1755_p11 = scmp.lt.u32.totalorder %s1753_s22, %s1749_s2  ;;  %p1757_p13 = scmp.lt.u32.totalorder %s1749_s2, %s2133_s4 }
 0xbf1   : > { %p1751_p7 = pnand %p1750_p6, %p1928_p4 }
 0xbf2   : > { %p1756_p12 = por %p1755_p11, %p1754_p10 }
 0xbf3   : > { %p1752_p9 = pneg %p1751_p7 }
 0xbf4   : > { %p1758_p0 = por %p1757_p13, %p1756_p12 }
 0xbf6   : > { %p1759_p1 = pnand %p1758_p0, %p1752_p9 }
 0xbf8   : > { %1762 = shalt.err (!%p1759_p1)
}
 0xbf9   : > { %1644 = dma.vmem_to_hbm [thread:$0]  (%p1928_p4), %s2135_s1, 128, %s2133_s4, %s1353_s15  }
 0xbfa PF: > { %p1650_p2 = scmp.ge.s32.totalorder %s1813_s30, 2  ;;  %s1379_s17 = sand.u32 1, %s1793_s25  }
 0xbfb   : > { %s1380_s28 = scalar_lea.sflag [#allocation3], %s1379_s17 }
 0xbfc   : > { %p1647_p3 = pnand %p1650_p2, %p1935_p8 }
 0xbfe   : > { %1788 = dma.done.wait (!%p1647_p3), %s1380_s28, 128  }
 0xbff   : > { %1790 = vsyncadd (!%p1647_p3), %s1380_s28, 4294967168  ;;  %s26_s30 = sadd.s32 1, %s1813_s30   ;;  %s2207_s25 = smov %s1797_s26 }
 0xc00   : > { %p23_p5 = scmp.ge.s32.totalorder %s26_s30, 4   ;;  %s2208_s26 = smov %s1801_s27 }
 0xc01   : > { %s2209_s27 = smov %s1941_s21  ;;  %s2210_s28 = smov %s1809_s29 }
 0xc02   : > { %s2211_s29 = smov %s2213_s16  ;;  %25 = sbr.rel (!%p23_p5) target bundleno = 10 (0xa), region = 112 }
 0xc09   :  { %1385 = vsyncpa [#allocation3], 1 }
 0xc0a   :  { %1387 = vsyncpa [#allocation3 + $0x1], 1 }

</bundles_post_ra>
